<compile_context>
chip_gen: v7x
topology: tpu7x:2x2x1
jax: 0.10.0
libtpu: 0.0.40
codegen_flags: <defaults>
</compile_context>

<pallas_src>
import functools

import jax
import jax.numpy as jnp
from jax.experimental import pallas as pl
from jax.experimental.pallas import tpu as pltpu


def _round_up(a, b):
    return (a + b - 1) // b * b


# ---------------------------------------------------------------------------
# Kernel: 4 sub-pixel phase GEMMs over a shared 9-tap patch matrix,
#         + fused per-tile BatchNorm partial statistics.
# ---------------------------------------------------------------------------
def _phase_gemm_stats_kernel(a_ref, b_ref, c_ref, sum_ref, ssq_ref):
    # a_ref:   [K9, tm]       shared 9-tap patch rows (K on sublanes, m on lanes)
    # b_ref:   [4, Cout, K9]  per-phase weights (structural zeros for unused taps)
    # c_ref:   [4, Cout, tm]  conv output, channel-major, lane-dense
    # sum_ref / ssq_ref: [1, Cout, 1] per-tile partial sums for BatchNorm
    a = a_ref[...]
    cout = b_ref.shape[1]
    acc_s = jnp.zeros((cout, 1), jnp.float32)
    acc_q = jnp.zeros((cout, 1), jnp.float32)
    for p in range(4):  # static unroll over the 4 output phases (oy%2, ox%2)
        c = jnp.dot(b_ref[p], a, preferred_element_type=jnp.float32)  # [Cout, tm]
        c_ref[p] = c
        acc_s = acc_s + jnp.sum(c, axis=1, keepdims=True)
        acc_q = acc_q + jnp.sum(c * c, axis=1, keepdims=True)
    sum_ref[0] = acc_s
    ssq_ref[0] = acc_q


@functools.partial(jax.jit, static_argnames=("tm_target", "bn_eps"))
def upsample_forward(x, w_t, conv_bias, bn_gamma, bn_beta, *, tm_target=2048, bn_eps=1e-5):
    """Forward of `upsample`: ReLU -> ConvTranspose2d(k=4,s=2,p=1) -> BatchNorm2d (train mode).

    x:         [N, Cin, H, W]    (NCHW)
    w_t:       [Cin, Cout, 4, 4] (PyTorch ConvTranspose2d weight layout)
    conv_bias: [Cout]  -- unused: a per-channel bias is exactly cancelled by the
                          train-mode BatchNorm mean subtraction (dead work).
    Returns    [N, Cout, 2H, 2W] (NCHW)
    """
    N, Cin, H, W = x.shape
    Cout = w_t.shape[1]
    OH, OW = 2 * H, 2 * W
    K9 = 9 * Cin
    M1 = N * H * W                      # rows per phase (flattened n, y, x)
    del conv_bias                       # cancels exactly under train-mode BN

    xf = x.astype(jnp.float32)
    wf = w_t.astype(jnp.float32)

    # m-tile: large (amortize ~0.35us/step), multiple of 128 (lane-dense stores),
    # capped so the double-buffered A+C tiles stay comfortably inside scoped VMEM
    # on every chip generation (v5e 16 MiB default .. v7x 64 MiB physical).
    bytes_per_m = (K9 + 4 * Cout) * 4 * 2          # A+C, f32, double-buffered
    tm_cap = max(128, (8 * 1024 * 1024 // bytes_per_m) // 128 * 128)
    tm = min(tm_target, tm_cap, _round_up(M1, 128))
    Mp = _round_up(M1, tm)
    num_tiles = Mp // tm

    # ---- glue (input-sized, cheap): ReLU + pad + shared 9-tap patch gather ----
    # Phase decomposition of ConvTranspose2d(k=4, s=2, p=1):
    #   out[n, co, 2y+py, 2x+px] =
    #     sum_{ci,dy,dx} xpad[n, ci, y+py+dy, x+px+dx] * w_t[ci, co, 3-py-2dy, 3-px-2dx]
    # Tap offsets (py+dy, px+dx) across all 4 phases form a 3x3 set -> share one A9.
    xr = jnp.maximum(xf, 0.0)                               # ReLU once, on the raw input
    xpad = jnp.pad(xr, ((0, 0), (0, 0), (1, 1), (1, 1)))    # [N, Cin, H+2, W+2]

    taps = [xpad[:, :, ty:ty + H, tx:tx + W]                # 9 x [N, Cin, H, W]
            for ty in range(3) for tx in range(3)]
    a9 = jnp.stack(taps, axis=0)                            # [9, N, Cin, H, W]
    a9 = a9.transpose(0, 2, 1, 3, 4).reshape(K9, M1)        # k=(tap, ci), m=(n, y, x)
    if Mp != M1:
        a9 = jnp.pad(a9, ((0, 0), (0, Mp - M1)))            # zero cols -> exact zero outputs

    # per-phase weights on the shared 9-tap K axis (zeros for the 5 unused taps):
    #   b9[(py,px), co, (ty,tx,ci)] = w_t[ci, co, 3-py-2dy, 3-px-2dx]  where ty=py+dy, tx=px+dx
    b9 = jnp.zeros((4, Cout, 3, 3, Cin), jnp.float32)
    for py in range(2):
        for px in range(2):
            for dy in range(2):
                for dx in range(2):
                    b9 = b9.at[2 * py + px, :, py + dy, px + dx, :].set(
                        wf[:, :, 3 - py - 2 * dy, 3 - px - 2 * dx].T)
    b9 = b9.reshape(4, Cout, K9)

    # ---- Pallas pass: fused phase-GEMMs + BN partial statistics --------------------
    conv_c, sum_part, ssq_part = pl.pallas_call(
        _phase_gemm_stats_kernel,
        out_shape=(
            jax.ShapeDtypeStruct((4, Cout, Mp), jnp.float32),
            jax.ShapeDtypeStruct((num_tiles, Cout, 1), jnp.float32),
            jax.ShapeDtypeStruct((num_tiles, Cout, 1), jnp.float32),
        ),
        grid_spec=pltpu.PrefetchScalarGridSpec(
            num_scalar_prefetch=0,
            grid=(num_tiles,),
            in_specs=[
                pl.BlockSpec((K9, tm), lambda i: (0, i)),
                pl.BlockSpec((4, Cout, K9), lambda i: (0, 0, 0)),
            ],
            out_specs=(
                pl.BlockSpec((4, Cout, tm), lambda i: (0, 0, i)),
                pl.BlockSpec((1, Cout, 1), lambda i: (i, 0, 0)),
                pl.BlockSpec((1, Cout, 1), lambda i: (i, 0, 0)),
            ),
        ),
        compiler_params=pltpu.CompilerParams(dimension_semantics=("parallel",)),
    )(a9, b9)

    # ---- tiny glue: finish BatchNorm statistics (train-mode batch statistics) -----
    count = 4.0 * M1                                          # = N * OH * OW
    mean = sum_part.sum(axis=0)[:, 0] / count                 # [Cout]
    var = ssq_part.sum(axis=0)[:, 0] / count - mean * mean    # biased, as PyTorch normalizes
    scale = bn_gamma.astype(jnp.float32) * jax.lax.rsqrt(var + bn_eps)
    shift = bn_beta.astype(jnp.float32) - mean * scale

    # ---- single fused XLA pass: normalize + interleave the 4 phases into NCHW ------
    # (elementwise scale/shift fuses into the transpose; one read of conv_c, one write
    #  of the NCHW output — fewer HBM passes than a separate normalize kernel + transpose)
    out = conv_c[:, :, :M1] * scale[None, :, None] + shift[None, :, None]
    out = out.reshape(2, 2, Cout, N, H, W)                    # [py, px, co, n, y, x]
    out = out.transpose(3, 2, 4, 0, 5, 1).reshape(N, Cout, OH, OW)
    # drop_out=False -> nn.Identity(), nothing to do.
    return out


if __name__ == "__main__":
    key = jax.random.PRNGKey(0)
    k_x, k_w, k_b = jax.random.split(key, 3)

    N, Cin, Cout, H, W = 2, 4, 8, 16, 16
    x = jax.random.normal(k_x, (N, Cin, H, W), dtype=jnp.float32)
    w_t = 0.1 * jax.random.normal(k_w, (Cin, Cout, 4, 4), dtype=jnp.float32)
    conv_bias = 0.1 * jax.random.normal(k_b, (Cout,), dtype=jnp.float32)
    bn_gamma = jnp.ones((Cout,), jnp.float32)    # PyTorch default affine init
    bn_beta = jnp.zeros((Cout,), jnp.float32)

    out = upsample_forward(x, w_t, conv_bias, bn_gamma, bn_beta)
    out = jax.block_until_ready(out)
    assert out.shape == (N, Cout, 2 * H, 2 * W), out.shape
    assert bool(jnp.all(jnp.isfinite(out)))

    # Pure-JAX reference straight from the PyTorch ConvTranspose2d "scatter" definition
    # (stride 2, padding 1, + bias) followed by train-mode BatchNorm2d.
    xr = jnp.maximum(x, 0.0)
    up = jnp.einsum('nchw,cdij->ndijhw', xr, w_t)             # [N, Cout, ky, kx, H, W]
    full = jnp.zeros((N, Cout, 2 * H + 2, 2 * W + 2), jnp.float32)
    for ky in range(4):
        for kx in range(4):
            full = full.at[:, :, ky:ky + 2 * H - 1:2, kx:kx + 2 * W - 1:2].add(up[:, :, ky, kx])
    conv_ref = full[:, :, 1:2 * H + 1, 1:2 * W + 1] + conv_bias[None, :, None, None]
    mu = conv_ref.mean(axis=(0, 2, 3), keepdims=True)
    var = ((conv_ref - mu) ** 2).mean(axis=(0, 2, 3), keepdims=True)
    ref = (conv_ref - mu) * jax.lax.rsqrt(var + 1e-5)
    ref = ref * bn_gamma[None, :, None, None] + bn_beta[None, :, None, None]
    err = float(jnp.max(jnp.abs(out - ref)))
    assert err < 2e-3, f"max abs error vs reference: {err}"

    print("KERNEL_OK")
</pallas_src>

<mosaic_0001>
module attributes {stable_mosaic.version = 11 : i64} {
  func.func @_phase_gemm_stats_kernel(%arg0: i32, %arg1: memref<36x512xf32, #tpu.memory_space<vmem>>, %arg2: memref<4x8x36xf32, #tpu.memory_space<vmem>>, %arg3: memref<4x8x512xf32, #tpu.memory_space<vmem>>, %arg4: memref<1x8x1xf32, #tpu.memory_space<vmem>>, %arg5: memref<1x8x1xf32, #tpu.memory_space<vmem>>) attributes {dimension_semantics = [#tpu.dimension_semantics<parallel>], iteration_bounds = array<i64: 1>, scalar_prefetch = 0 : i64, scratch_operands = 0 : i64, tpu.core_type = #tpu.core_type<tc>, window_params = [{transform_indices = @transform_0, window_bounds = array<i64: 36, 512>}, {pipeline_mode = #tpu.pipeline_mode<synchronous>, transform_indices = @transform_1, window_bounds = array<i64: 4, 8, 36>}, {transform_indices = @transform_2, window_bounds = array<i64: 4, 8, 512>}, {transform_indices = @transform_3, window_bounds = array<i64: 1, 8, 1>}, {transform_indices = @transform_4, window_bounds = array<i64: 1, 8, 1>}]} {
    %c0 = arith.constant 0 : index
    %c0_0 = arith.constant 0 : index
    %0 = vector.load %arg1[%c0, %c0_0] : memref<36x512xf32, #tpu.memory_space<vmem>>, vector<36x512xf32>
    %cst = arith.constant 0.000000e+00 : f32
    %1 = vector.broadcast %cst : f32 to vector<8x1xf32>
    %cst_1 = arith.constant 0.000000e+00 : f32
    %2 = vector.broadcast %cst_1 : f32 to vector<8x1xf32>
    %c0_2 = arith.constant 0 : index
    %c0_3 = arith.constant 0 : index
    %c0_4 = arith.constant 0 : index
    %3 = vector.load %arg2[%c0_2, %c0_3, %c0_4] : memref<4x8x36xf32, #tpu.memory_space<vmem>>, vector<1x8x36xf32>
    %4 = vector.shape_cast %3 : vector<1x8x36xf32> to vector<8x36xf32>
    %cst_5 = arith.constant dense<0.000000e+00> : vector<8x512xf32>
    %5 = tpu.matmul %4, %0, %cst_5 {dimension_numbers = #tpu.dot_dimension_numbers<[1], [0], [0], [1], [0, 0, 1, 1], [], []>} : vector<8x36xf32>, vector<36x512xf32>, vector<8x512xf32> -> vector<8x512xf32>
    %c0_6 = arith.constant 0 : index
    %c0_7 = arith.constant 0 : index
    %c0_8 = arith.constant 0 : index
    %6 = vector.load %arg3[%c0_6, %c0_7, %c0_8] : memref<4x8x512xf32, #tpu.memory_space<vmem>>, vector<1x8x512xf32>
    %7 = vector.shape_cast %6 : vector<1x8x512xf32> to vector<8x512xf32>
    %8 = vector.shape_cast %5 : vector<8x512xf32> to vector<1x8x512xf32>
    tpu.vector_store %arg3[%c0_6, %c0_7, %c0_8], %8 {strides = array<i32>} : memref<4x8x512xf32, #tpu.memory_space<vmem>>, vector<1x8x512xf32>,
    %cst_9 = arith.constant dense<0.000000e+00> : vector<8xf32>
    %9 = vector.multi_reduction <add>, %5, %cst_9 [1] : vector<8x512xf32> to vector<8xf32>
    %10 = vector.shape_cast %9 : vector<8xf32> to vector<8x1xf32>
    %11 = arith.addf %1, %10 : vector<8x1xf32>
    %12 = arith.mulf %5, %5 : vector<8x512xf32>
    %cst_10 = arith.constant dense<0.000000e+00> : vector<8xf32>
    %13 = vector.multi_reduction <add>, %12, %cst_10 [1] : vector<8x512xf32> to vector<8xf32>
    %14 = vector.shape_cast %13 : vector<8xf32> to vector<8x1xf32>
    %15 = arith.addf %2, %14 : vector<8x1xf32>
    %c1 = arith.constant 1 : index
    %c0_11 = arith.constant 0 : index
    %c0_12 = arith.constant 0 : index
    %16 = vector.load %arg2[%c1, %c0_11, %c0_12] : memref<4x8x36xf32, #tpu.memory_space<vmem>>, vector<1x8x36xf32>
    %17 = vector.shape_cast %16 : vector<1x8x36xf32> to vector<8x36xf32>
    %cst_13 = arith.constant dense<0.000000e+00> : vector<8x512xf32>
    %18 = tpu.matmul %17, %0, %cst_13 {dimension_numbers = #tpu.dot_dimension_numbers<[1], [0], [0], [1], [0, 0, 1, 1], [], []>} : vector<8x36xf32>, vector<36x512xf32>, vector<8x512xf32> -> vector<8x512xf32>
    %c1_14 = arith.constant 1 : index
    %c0_15 = arith.constant 0 : index
    %c0_16 = arith.constant 0 : index
    %19 = vector.load %arg3[%c1_14, %c0_15, %c0_16] : memref<4x8x512xf32, #tpu.memory_space<vmem>>, vector<1x8x512xf32>
    %20 = vector.shape_cast %19 : vector<1x8x512xf32> to vector<8x512xf32>
    %21 = vector.shape_cast %18 : vector<8x512xf32> to vector<1x8x512xf32>
    tpu.vector_store %arg3[%c1_14, %c0_15, %c0_16], %21 {strides = array<i32>} : memref<4x8x512xf32, #tpu.memory_space<vmem>>, vector<1x8x512xf32>,
    %cst_17 = arith.constant dense<0.000000e+00> : vector<8xf32>
    %22 = vector.multi_reduction <add>, %18, %cst_17 [1] : vector<8x512xf32> to vector<8xf32>
    %23 = vector.shape_cast %22 : vector<8xf32> to vector<8x1xf32>
    %24 = arith.addf %11, %23 : vector<8x1xf32>
    %25 = arith.mulf %18, %18 : vector<8x512xf32>
    %cst_18 = arith.constant dense<0.000000e+00> : vector<8xf32>
    %26 = vector.multi_reduction <add>, %25, %cst_18 [1] : vector<8x512xf32> to vector<8xf32>
    %27 = vector.shape_cast %26 : vector<8xf32> to vector<8x1xf32>
    %28 = arith.addf %15, %27 : vector<8x1xf32>
    %c2 = arith.constant 2 : index
    %c0_19 = arith.constant 0 : index
    %c0_20 = arith.constant 0 : index
    %29 = vector.load %arg2[%c2, %c0_19, %c0_20] : memref<4x8x36xf32, #tpu.memory_space<vmem>>, vector<1x8x36xf32>
    %30 = vector.shape_cast %29 : vector<1x8x36xf32> to vector<8x36xf32>
    %cst_21 = arith.constant dense<0.000000e+00> : vector<8x512xf32>
    %31 = tpu.matmul %30, %0, %cst_21 {dimension_numbers = #tpu.dot_dimension_numbers<[1], [0], [0], [1], [0, 0, 1, 1], [], []>} : vector<8x36xf32>, vector<36x512xf32>, vector<8x512xf32> -> vector<8x512xf32>
    %c2_22 = arith.constant 2 : index
    %c0_23 = arith.constant 0 : index
    %c0_24 = arith.constant 0 : index
    %32 = vector.load %arg3[%c2_22, %c0_23, %c0_24] : memref<4x8x512xf32, #tpu.memory_space<vmem>>, vector<1x8x512xf32>
    %33 = vector.shape_cast %32 : vector<1x8x512xf32> to vector<8x512xf32>
    %34 = vector.shape_cast %31 : vector<8x512xf32> to vector<1x8x512xf32>
    tpu.vector_store %arg3[%c2_22, %c0_23, %c0_24], %34 {strides = array<i32>} : memref<4x8x512xf32, #tpu.memory_space<vmem>>, vector<1x8x512xf32>,
    %cst_25 = arith.constant dense<0.000000e+00> : vector<8xf32>
    %35 = vector.multi_reduction <add>, %31, %cst_25 [1] : vector<8x512xf32> to vector<8xf32>
    %36 = vector.shape_cast %35 : vector<8xf32> to vector<8x1xf32>
    %37 = arith.addf %24, %36 : vector<8x1xf32>
    %38 = arith.mulf %31, %31 : vector<8x512xf32>
    %cst_26 = arith.constant dense<0.000000e+00> : vector<8xf32>
    %39 = vector.multi_reduction <add>, %38, %cst_26 [1] : vector<8x512xf32> to vector<8xf32>
    %40 = vector.shape_cast %39 : vector<8xf32> to vector<8x1xf32>
    %41 = arith.addf %28, %40 : vector<8x1xf32>
    %c3 = arith.constant 3 : index
    %c0_27 = arith.constant 0 : index
    %c0_28 = arith.constant 0 : index
    %42 = vector.load %arg2[%c3, %c0_27, %c0_28] : memref<4x8x36xf32, #tpu.memory_space<vmem>>, vector<1x8x36xf32>
    %43 = vector.shape_cast %42 : vector<1x8x36xf32> to vector<8x36xf32>
    %cst_29 = arith.constant dense<0.000000e+00> : vector<8x512xf32>
    %44 = tpu.matmul %43, %0, %cst_29 {dimension_numbers = #tpu.dot_dimension_numbers<[1], [0], [0], [1], [0, 0, 1, 1], [], []>} : vector<8x36xf32>, vector<36x512xf32>, vector<8x512xf32> -> vector<8x512xf32>
    %c3_30 = arith.constant 3 : index
    %c0_31 = arith.constant 0 : index
    %c0_32 = arith.constant 0 : index
    %45 = vector.load %arg3[%c3_30, %c0_31, %c0_32] : memref<4x8x512xf32, #tpu.memory_space<vmem>>, vector<1x8x512xf32>
    %46 = vector.shape_cast %45 : vector<1x8x512xf32> to vector<8x512xf32>
    %47 = vector.shape_cast %44 : vector<8x512xf32> to vector<1x8x512xf32>
    tpu.vector_store %arg3[%c3_30, %c0_31, %c0_32], %47 {strides = array<i32>} : memref<4x8x512xf32, #tpu.memory_space<vmem>>, vector<1x8x512xf32>,
    %cst_33 = arith.constant dense<0.000000e+00> : vector<8xf32>
    %48 = vector.multi_reduction <add>, %44, %cst_33 [1] : vector<8x512xf32> to vector<8xf32>
    %49 = vector.shape_cast %48 : vector<8xf32> to vector<8x1xf32>
    %50 = arith.addf %37, %49 : vector<8x1xf32>
    %51 = arith.mulf %44, %44 : vector<8x512xf32>
    %cst_34 = arith.constant dense<0.000000e+00> : vector<8xf32>
    %52 = vector.multi_reduction <add>, %51, %cst_34 [1] : vector<8x512xf32> to vector<8xf32>
    %53 = vector.shape_cast %52 : vector<8xf32> to vector<8x1xf32>
    %54 = arith.addf %41, %53 : vector<8x1xf32>
    %c0_35 = arith.constant 0 : index
    %c0_36 = arith.constant 0 : index
    %c0_37 = arith.constant 0 : index
    %55 = vector.load %arg4[%c0_35, %c0_36, %c0_37] : memref<1x8x1xf32, #tpu.memory_space<vmem>>, vector<1x8x1xf32>
    %56 = vector.shape_cast %55 : vector<1x8x1xf32> to vector<8x1xf32>
    %57 = vector.shape_cast %50 : vector<8x1xf32> to vector<1x8x1xf32>
    tpu.vector_store %arg4[%c0_35, %c0_36, %c0_37], %57 {strides = array<i32>} : memref<1x8x1xf32, #tpu.memory_space<vmem>>, vector<1x8x1xf32>,
    %c0_38 = arith.constant 0 : index
    %c0_39 = arith.constant 0 : index
    %c0_40 = arith.constant 0 : index
    %58 = vector.load %arg5[%c0_38, %c0_39, %c0_40] : memref<1x8x1xf32, #tpu.memory_space<vmem>>, vector<1x8x1xf32>
    %59 = vector.shape_cast %58 : vector<1x8x1xf32> to vector<8x1xf32>
    %60 = vector.shape_cast %54 : vector<8x1xf32> to vector<1x8x1xf32>
    tpu.vector_store %arg5[%c0_38, %c0_39, %c0_40], %60 {strides = array<i32>} : memref<1x8x1xf32, #tpu.memory_space<vmem>>, vector<1x8x1xf32>,
    return
  }
  func.func @transform_0(%arg0: i32) -> (i32, i32) {
    %c0_i32 = arith.constant 0 : i32
    %c0_i32_0 = arith.constant 0 : i32
    return %c0_i32, %arg0 : i32, i32
  }
  func.func @transform_1(%arg0: i32) -> (i32, i32, i32) {
    %c0_i32 = arith.constant 0 : i32
    %c0_i32_0 = arith.constant 0 : i32
    %c0_i32_1 = arith.constant 0 : i32
    %c0_i32_2 = arith.constant 0 : i32
    return %c0_i32, %c0_i32_0, %c0_i32_1 : i32, i32, i32
  }
  func.func @transform_2(%arg0: i32) -> (i32, i32, i32) {
    %c0_i32 = arith.constant 0 : i32
    %c0_i32_0 = arith.constant 0 : i32
    %c0_i32_1 = arith.constant 0 : i32
    return %c0_i32, %c0_i32_0, %arg0 : i32, i32, i32
  }
  func.func @transform_3(%arg0: i32) -> (i32, i32, i32) {
    %c0_i32 = arith.constant 0 : i32
    %c0_i32_0 = arith.constant 0 : i32
    %c0_i32_1 = arith.constant 0 : i32
    return %arg0, %c0_i32, %c0_i32_0 : i32, i32, i32
  }
  func.func @transform_4(%arg0: i32) -> (i32, i32, i32) {
    %c0_i32 = arith.constant 0 : i32
    %c0_i32_0 = arith.constant 0 : i32
    %c0_i32_1 = arith.constant 0 : i32
    return %arg0, %c0_i32, %c0_i32_0 : i32, i32, i32
  }
}

</mosaic_0001>

<bundles_post_ra>
// kernel: upsample_forward.1
= control target key start
LH: loop header
LB: loop body
LE: loop exit
PB: predicated region body
PF: predicated region fallthrough
CT: control target
= control target key end

     0   :  { %v837_v3 = vmov 0.0   ;;  %vm39_vm0 = vcmask 1043456   ;;  %vm35_vm1 = vcmask 293888   ;;  %vm718_vm2 = vcmask 7168   ;;  %s1057_s0 = inlined_call_operand.vmem [shape: f32[36,512], index: 0, kind: input, shape index: {}]   ;;  %s1058_s1 = inlined_call_operand.vmem [shape: f32[4,8,36], index: 1, kind: input, shape index: {}]   ;;  %s1059_s2 = inlined_call_operand.vmem [shape: f32[4,8,512], index: 2, kind: output, shape index: {0}]   ;;  %s1060_s3 = inlined_call_operand.vmem [shape: f32[1,8,1], index: 3, kind: output, shape index: {1}]   ;;  %s1061_s4 = inlined_call_operand.vmem [shape: f32[1,8,1], index: 4, kind: output, shape index: {2}]  }
   0x1   :  { %v15_v0 = vld [vmem:[%s1057_s0 + $0x8] sm:$0xff]  ;;  %v14_v2 = vld [vmem:[%s1057_s0] sm:$0xff]  ;;  %116 = vmatprep.mubr.f32.mxu0 %v837_v3  ;;  %187 = vmatprep.mubr.f32.mxu1 %v837_v3  ;;  %v17_v6 = vld [vmem:[%s1057_s0 + $0x18] sm:$0xff] }
   0x2   :  { %v19_v1 = vld [vmem:[%s1057_s0 + $0x28] sm:$0xff]  ;;  %v18_v5 = vld [vmem:[%s1057_s0 + $0x20] sm:$0xff]  ;;  %v21_v7 = vld [vmem:[%s1057_s0 + $0x38] sm:$0xff] }
   0x3   :  { %v874_v4 = vpack.c.bf16 %v19_v1, %v15_v0  ;;  %v885_v8 = vpack.c.bf16 %v18_v5, %v14_v2  ;;  %v887_v9 = vpack.c.bf16 %v21_v7, %v17_v6  ;;  %v16_v10 = vld [vmem:[%s1057_s0 + $0x10] sm:$0xff]  ;;  %v23_v12 = vld [vmem:[%s1057_s0 + $0x48] sm:$0xff]  ;;  %v22_v15 = vld [vmem:[%s1057_s0 + $0x40] sm:$0xff] }
   0x4   :  { %v20_v11 = vld [vmem:[%s1057_s0 + $0x30] sm:$0xff]  ;;  %v27_v14 = vld [vmem:[%s1057_s0 + $0x68] sm:$0xff]  ;;  %v26_v16 = vld [vmem:[%s1057_s0 + $0x60] sm:$0xff] }
   0x5   :  { %773 = vmatprep.subr.bf16.mxu0 %v874_v4  ;;  %v899_v13 = vpack.c.bf16 %v20_v11, %v16_v10  ;;  %781 = vmatprep.subr.bf16.mxu1 %v887_v9  ;;  %v912_v17 = vpack.c.bf16 %v27_v14, %v23_v12  ;;  %v914_v18 = vpack.c.bf16 %v26_v16, %v22_v15  ;;  %v25_v19 = vld [vmem:[%s1057_s0 + $0x58] sm:$0xff]  ;;  %v24_v21 = vld [vmem:[%s1057_s0 + $0x50] sm:$0xff]  ;;  %v31_v25 = vld [vmem:[%s1057_s0 + $0x88] sm:$0xf] }
   0x6   :  { %775 = vmatpush1.bf16.msra.mxu0 %v885_v8  ;;  %v29_v20 = vld [vmem:[%s1057_s0 + $0x78] sm:$0xff]  ;;  %v28_v23 = vld [vmem:[%s1057_s0 + $0x70] sm:$0xff]  ;;  %v30_v27 = vld [vmem:[%s1057_s0 + $0x80] sm:$0xf] }
   0x7   :  { %783 = vmatpush1.bf16.msra.mxu1 %v899_v13  ;;  %v784_v22 = vpack.c.bf16 %v29_v20, %v25_v19  ;;  %777 = vmatprep.subr.bf16.mxu0 %v912_v17  ;;  %v786_v24 = vpack.c.bf16 %v28_v23, %v24_v21  ;;  %v33_v26 = vld [vmem:[%s1057_s0 + $0x98] sm:$0xf]  ;;  %v34_v28 = vld [vmem:[%s1058_s1] sm:$0xff]  ;;  %v32_v29 = vld [vmem:[%s1057_s0 + $0x90] sm:$0xf] }
   0x8   :  { %v739_v30 = vld [vmem:[%s1058_s1 + $0x8] sm:$0xff]  ;;  %v750_v31 = vld [vmem:[%s1058_s1 + $0x10] sm:$0xff]  ;;  %v761_v32 = vld [vmem:[%s1058_s1 + $0x18] sm:$0xff] }
   0x9   :  { %785 = vmatprep.subr.bf16.mxu1 %v784_v22 }
   0xa   :  { %779 = vmatpush1.bf16.msra.mxu0 %v914_v18 }
   0xb   :  { %787 = vmatpush1.bf16.msra.mxu1 %v786_v24  ;;  %733 = vmatprep.subr.msk.mxu0 %vm39_vm0, %v31_v25 }
   0xc   :  { %736 = vmatprep.subr.msk.mxu1 %vm39_vm0, %v33_v26 }
   0xe   :  { %734 = vmatpush1.msk.msra.mxu0 %vm39_vm0, %v30_v27 }
   0xf   :  { %735 = vmatmul.mubr.msk.f32.vlgmr.msra.gmra.mrb[0].mxu0 %vm35_vm1, %v34_v28  ;;  %789 = vmatprep.subr.bf16.mxu0 %v874_v4 }
  0x10   :  { %737 = vmatpush1.msk.msra.mxu1 %vm39_vm0, %v32_v29  ;;  %791 = vmatpush1.bf16.msra.mxu0 %v885_v8 }
  0x11   :  { %797 = vmatprep.subr.bf16.mxu1 %v887_v9  ;;  %738 = vmatmul.mubr.msk.f32.vlgmr.msra.gmra.mrb[0].mxu1 %vm35_vm1, %v34_v28 }
  0x12   :  { %799 = vmatpush1.bf16.msra.mxu1 %v899_v13  ;;  %793 = vmatprep.subr.bf16.mxu0 %v912_v17 }
  0x13   :  { %801 = vmatprep.subr.bf16.mxu1 %v784_v22  ;;  %283 = vmatprep.mubr.f32.mxu0 %v837_v3 }
  0x14   :  { %795 = vmatpush1.bf16.msra.mxu0 %v914_v18  ;;  %354 = vmatprep.mubr.f32.mxu1 %v837_v3 }
  0x15   :  { %740 = vmatprep.subr.msk.mxu0 %vm39_vm0, %v31_v25 }
  0x16   :  { %803 = vmatpush1.bf16.msra.mxu1 %v786_v24 }
  0x17   :  { %743 = vmatprep.subr.msk.mxu1 %vm39_vm0, %v33_v26 }
  0x18   :  { %741 = vmatpush1.msk.msra.mxu0 %vm39_vm0, %v30_v27 }
  0x19   :  { %742 = vmatmul.mubr.msk.f32.vlgmr.msra.gmra.mrb[2].mxu0 %vm35_vm1, %v739_v30  ;;  %805 = vmatprep.subr.bf16.mxu0 %v874_v4 }
  0x1a   :  { %744 = vmatpush1.msk.msra.mxu1 %vm39_vm0, %v32_v29  ;;  %807 = vmatpush1.bf16.msra.mxu0 %v885_v8 }
  0x1b   :  { %813 = vmatprep.subr.bf16.mxu1 %v887_v9  ;;  %745 = vmatmul.mubr.msk.f32.vlgmr.msra.gmra.mrb[2].mxu1 %vm35_vm1, %v739_v30 }
  0x1c   :  { %815 = vmatpush1.bf16.msra.mxu1 %v899_v13  ;;  %809 = vmatprep.subr.bf16.mxu0 %v912_v17 }
  0x1d   :  { %817 = vmatprep.subr.bf16.mxu1 %v784_v22  ;;  %451 = vmatprep.mubr.f32.mxu0 %v837_v3 }
  0x1e   :  { %811 = vmatpush1.bf16.msra.mxu0 %v914_v18  ;;  %522 = vmatprep.mubr.f32.mxu1 %v837_v3 }
  0x1f   :  { %751 = vmatprep.subr.msk.mxu0 %vm39_vm0, %v31_v25 }
  0x20   :  { %819 = vmatpush1.bf16.msra.mxu1 %v786_v24 }
  0x21   :  { %754 = vmatprep.subr.msk.mxu1 %vm39_vm0, %v33_v26 }
  0x22   :  { %752 = vmatpush1.msk.msra.mxu0 %vm39_vm0, %v30_v27 }
  0x23   :  { %753 = vmatmul.mubr.msk.f32.vlgmr.msra.gmra.mrb[4].mxu0 %vm35_vm1, %v750_v31  ;;  %821 = vmatprep.subr.bf16.mxu0 %v874_v4 }
  0x24   :  { %755 = vmatpush1.msk.msra.mxu1 %vm39_vm0, %v32_v29  ;;  %823 = vmatpush1.bf16.msra.mxu0 %v885_v8 }
  0x25   :  { %829 = vmatprep.subr.bf16.mxu1 %v887_v9  ;;  %756 = vmatmul.mubr.msk.f32.vlgmr.msra.gmra.mrb[4].mxu1 %vm35_vm1, %v750_v31 }
  0x26   :  { %831 = vmatpush1.bf16.msra.mxu1 %v899_v13  ;;  %825 = vmatprep.subr.bf16.mxu0 %v912_v17 }
  0x27   :  { %833 = vmatprep.subr.bf16.mxu1 %v784_v22  ;;  %619 = vmatprep.mubr.f32.mxu0 %v837_v3 }
  0x28   :  { %827 = vmatpush1.bf16.msra.mxu0 %v914_v18  ;;  %690 = vmatprep.mubr.f32.mxu1 %v837_v3 }
  0x29   :  { %762 = vmatprep.subr.msk.mxu0 %vm39_vm0, %v31_v25 }
  0x2a   :  { %835 = vmatpush1.bf16.msra.mxu1 %v786_v24 }
  0x2b   :  { %765 = vmatprep.subr.msk.mxu1 %vm39_vm0, %v33_v26 }
  0x2c   :  { %763 = vmatpush1.msk.msra.mxu0 %vm39_vm0, %v30_v27 }
  0x2d   :  { %764 = vmatmul.mubr.msk.f32.vlgmr.msra.gmra.mrb[6].mxu0 %vm35_vm1, %v761_v32 }
  0x2e   :  { %766 = vmatpush1.msk.msra.mxu1 %vm39_vm0, %v32_v29 }
  0x2f   :  { %767 = vmatmul.mubr.msk.f32.vlgmr.msra.gmra.mrb[6].mxu1 %vm35_vm1, %v761_v32 }
  0xe2   :  { %v118_v33 = vpop.f32.mrb[0].mxu0 }
  0xe3   :  { %194 = vst [vmem:[%s1059_s2] sm:$0xff] %v118_v33  ;;  %v204_v34 = vmul.f32 %v118_v33, %v118_v33  ;;  %v120_v35 = vpop.f32.mrb[1].mxu0 }
  0xe4   :  { %195 = vst [vmem:[%s1059_s2 + $0x8] sm:$0xff] %v120_v35  ;;  %v198_v36 = vadd.f32 %v120_v35, %v118_v33  ;;  %v205_v37 = vmul.f32 %v120_v35, %v120_v35  ;;  %v189_v38 = vpop.f32.mrb[0].mxu1 }
  0xe5   :  { %196 = vst [vmem:[%s1059_s2 + $0x10] sm:$0xff] %v189_v38  ;;  %v206_v39 = vmul.f32 %v189_v38, %v189_v38  ;;  %v191_v40 = vpop.f32.mrb[1].mxu1 }
  0xe6   :  { %197 = vst [vmem:[%s1059_s2 + $0x18] sm:$0xff] %v191_v40  ;;  %v199_v41 = vadd.f32 %v198_v36, %v189_v38  ;;  %v207_v42 = vmul.f32 %v191_v40, %v191_v40  ;;  %v208_v43 = vadd.f32 %v205_v37, %v204_v34 }
  0xe8   :  { %v200_v44 = vadd.f32 %v199_v41, %v191_v40  ;;  %v209_v45 = vadd.f32 %v208_v43, %v206_v39 }
  0xea   :  { %201 = vadd.xlane.f32.xlu0 %v200_v44  ;;  %v210_v46 = vadd.f32 %v209_v45, %v207_v42 }
  0xec   :  { %v285_v47 = vpop.f32.mrb[2].mxu0 }
  0xed   :  { %746 = vst [vmem:[%s1059_s2 + $0x20] sm:$0xff] %v285_v47  ;;  %v372_v48 = vmul.f32 %v285_v47, %v285_v47  ;;  %v287_v49 = vpop.f32.mrb[3].mxu0 }
  0xee   :  { %747 = vst [vmem:[%s1059_s2 + $0x28] sm:$0xff] %v287_v49  ;;  %v366_v50 = vadd.f32 %v287_v49, %v285_v47  ;;  %v373_v51 = vmul.f32 %v287_v49, %v287_v49  ;;  %211 = vadd.xlane.f32.xlu0 %v210_v46  ;;  %v356_v52 = vpop.f32.mrb[2].mxu1 }
  0xef   :  { %748 = vst [vmem:[%s1059_s2 + $0x30] sm:$0xff] %v356_v52  ;;  %v374_v53 = vmul.f32 %v356_v52, %v356_v52  ;;  %v358_v54 = vpop.f32.mrb[3].mxu1 }
  0xf0   :  { %749 = vst [vmem:[%s1059_s2 + $0x38] sm:$0xff] %v358_v54  ;;  %v367_v55 = vadd.f32 %v366_v50, %v356_v52  ;;  %v375_v56 = vmul.f32 %v358_v54, %v358_v54  ;;  %v376_v57 = vadd.f32 %v373_v51, %v372_v48 }
  0xf2   :  { %v368_v58 = vadd.f32 %v367_v55, %v358_v54  ;;  %v377_v59 = vadd.f32 %v376_v57, %v374_v53 }
  0xf4   :  { %369 = vadd.xlane.f32.xlu1 %v368_v58  ;;  %v378_v60 = vadd.f32 %v377_v59, %v375_v56 }
  0xf6   :  { %v453_v61 = vpop.f32.mrb[4].mxu0 }
  0xf7   :  { %757 = vst [vmem:[%s1059_s2 + $0x40] sm:$0xff] %v453_v61  ;;  %v540_v62 = vmul.f32 %v453_v61, %v453_v61  ;;  %v455_v63 = vpop.f32.mrb[5].mxu0 }
  0xf8   :  { %758 = vst [vmem:[%s1059_s2 + $0x48] sm:$0xff] %v455_v63  ;;  %v534_v0 = vadd.f32 %v455_v63, %v453_v61  ;;  %v541_v1 = vmul.f32 %v455_v63, %v455_v63  ;;  %379 = vadd.xlane.f32.xlu1 %v378_v60  ;;  %v524_v2 = vpop.f32.mrb[4].mxu1 }
  0xf9   :  { %759 = vst [vmem:[%s1059_s2 + $0x50] sm:$0xff] %v524_v2  ;;  %v542_v3 = vmul.f32 %v524_v2, %v524_v2  ;;  %v526_v4 = vpop.f32.mrb[5].mxu1 }
  0xfa   :  { %760 = vst [vmem:[%s1059_s2 + $0x58] sm:$0xff] %v526_v4  ;;  %v535_v5 = vadd.f32 %v534_v0, %v524_v2  ;;  %v543_v6 = vmul.f32 %v526_v4, %v526_v4  ;;  %v544_v7 = vadd.f32 %v541_v1, %v540_v62 }
  0xfc   :  { %v536_v8 = vadd.f32 %v535_v5, %v526_v4  ;;  %v545_v9 = vadd.f32 %v544_v7, %v542_v3 }
  0xfe   :  { %537 = vadd.xlane.f32.xlu0 %v536_v8  ;;  %v546_v10 = vadd.f32 %v545_v9, %v543_v6 }
 0x100   :  { %v621_v11 = vpop.f32.mrb[6].mxu0  ;;  %547 = vadd.xlane.f32.xlu1 %v546_v10 }
 0x101   :  { %768 = vst [vmem:[%s1059_s2 + $0x60] sm:$0xff] %v621_v11  ;;  %v708_v12 = vmul.f32 %v621_v11, %v621_v11  ;;  %v623_v13 = vpop.f32.mrb[7].mxu0 }
 0x102   :  { %769 = vst [vmem:[%s1059_s2 + $0x68] sm:$0xff] %v623_v13  ;;  %v702_v14 = vadd.f32 %v623_v13, %v621_v11  ;;  %v709_v15 = vmul.f32 %v623_v13, %v623_v13  ;;  %v692_v16 = vpop.f32.mrb[6].mxu1 }
 0x103   :  { %770 = vst [vmem:[%s1059_s2 + $0x70] sm:$0xff] %v692_v16  ;;  %v710_v17 = vmul.f32 %v692_v16, %v692_v16  ;;  %v694_v18 = vpop.f32.mrb[7].mxu1 }
 0x104   :  { %v712_v19 = vadd.f32 %v709_v15, %v708_v12  ;;  %771 = vst [vmem:[%s1059_s2 + $0x78] sm:$0xff] %v694_v18  ;;  %v703_v20 = vadd.f32 %v702_v14, %v692_v16  ;;  %v711_v21 = vmul.f32 %v694_v18, %v694_v18 }
 0x106   :  { %v704_v22 = vadd.f32 %v703_v20, %v694_v18  ;;  %v713_v23 = vadd.f32 %v712_v19, %v710_v17 }
 0x108   :  { %705 = vadd.xlane.f32.xlu0 %v704_v22  ;;  %v714_v24 = vadd.f32 %v713_v23, %v711_v21 }
 0x10a   :  { %715 = vadd.xlane.f32.xlu1 %v714_v24 }
 0x177   :  { %v202_v25 = vpop.xlane.xlu0 %201 }
 0x17b   :  { %v212_v27 = vpop.xlane.xlu0 %211 }
 0x181   :  { %v370_v26 = vpop.xlane.xlu1 %369 }
 0x182   :  { %v371_v30 = vadd.f32 %v370_v26, %v202_v25 }
 0x185   :  { %v380_v28 = vpop.xlane.xlu1 %379 }
 0x186   :  { %v381_v32 = vadd.f32 %v380_v28, %v212_v27 }
 0x18b   :  { %v538_v29 = vpop.xlane.xlu0 %537 }
 0x18c   :  { %v539_v33 = vadd.f32 %v538_v29, %v371_v30 }
 0x18d   :  { %v548_v31 = vpop.xlane.xlu1 %547 }
 0x18e   :  { %v549_v35 = vadd.f32 %v548_v31, %v381_v32 }
 0x195   :  { %v706_v34 = vpop.xlane.xlu0 %705 }
 0x196   :  { %v707_v36 = vadd.f32 %v706_v34, %v539_v33 }
 0x197   :  { %v716_v37 = vpop.xlane.xlu1 %715 }
 0x198   :  { %719 = vst.msk [vmem:[%s1060_s3] sm:$0xff] %vm718_vm2, %v707_v36  ;;  %v717_v38 = vadd.f32 %v716_v37, %v549_v35 }
 0x19a   :  { %720 = vst.msk [vmem:[%s1061_s4] sm:$0xff] %vm718_vm2, %v717_v38 }

</bundles_post_ra>
